<compile_context>
chip_gen: v7x
topology: tpu7x:2x2x1
jax: 0.10.0
libtpu: 0.0.40
codegen_flags: <defaults>
</compile_context>

<pallas_src>
import functools

import jax
import jax.numpy as jnp
from jax.experimental import pallas as pl
from jax.experimental.pallas import tpu as pltpu

F_IN, H0, H1, F_OUT = 9, 4, 4, 3


def _sigmoid(x):
    # Exactly sigmoid, but a single EUP transcendental per vreg.
    return 0.5 * (jnp.tanh(0.5 * x) + 1.0)


def mlp_kernel(p_ref, x_ref, o_ref):
    x = x_ref[...]  # (9, TB) f32, batch on the lane axis

    # Packed params layout (16, 16):
    #   rows 0:4  -> layer0: W0 (4,9) in cols 0:9,  b0 in col 9
    #   rows 4:8  -> layer1: W1 (4,4) in cols 0:4,  b1 in col 4
    #   rows 8:11 -> output: W2 (3,4) in cols 0:4,  b2 in col 4
    w0 = p_ref[0:4, 0:9]
    b0 = p_ref[0:4, 9:10]
    w1 = p_ref[4:8, 0:4]
    b1 = p_ref[4:8, 4:5]
    w2 = p_ref[8:11, 0:4]
    b2 = p_ref[8:11, 4:5]

    # y = W @ x + b  (weights stored PyTorch-style as (out, in)); all accumulation
    # in f32, results stay lane-dense (feature on sublanes, batch on lanes).
    h0 = jnp.dot(w0, x, preferred_element_type=jnp.float32) + b0   # (4, TB)
    h0 = _sigmoid(h0)
    h1 = jnp.dot(w1, h0, preferred_element_type=jnp.float32) + b1  # (4, TB)
    h1 = _sigmoid(h1)
    y = jnp.dot(w2, h1, preferred_element_type=jnp.float32) + b2   # (3, TB)

    o_ref[...] = y.astype(o_ref.dtype)


def pack_params(params):
    """Pack (out, in) weights + (out,) biases into a single (16, 16) f32 block."""
    p = jnp.zeros((16, 16), jnp.float32)
    p = p.at[0:4, 0:9].set(params["w0"])
    p = p.at[0:4, 9].set(params["b0"])
    p = p.at[4:8, 0:4].set(params["w1"])
    p = p.at[4:8, 4].set(params["b1"])
    p = p.at[8:11, 0:4].set(params["w2"])
    p = p.at[8:11, 4].set(params["b2"])
    return p


@functools.partial(jax.jit, static_argnames=("tb",))
def classifier_forward(x, params, *, tb=8192):
    """x: (B, 9) float32 -> (B, 3) float32, matching Classifier_torch.forward."""
    B = x.shape[0]
    assert x.shape[1] == F_IN

    # Batch tile: multiple of 128 lanes, capped at `tb` and at the padded batch.
    TB = min(tb, pl.cdiv(B, 128) * 128)
    Bp = pl.cdiv(B, TB) * TB
    nb = Bp // TB

    packed = pack_params(params)
    # Feature-major layout: (9, Bp), batch on lanes. Pad ragged batch with zeros.
    # (pad + cast + transpose fuse into one XLA copy; the kernel then reads each
    #  input byte exactly once as lane-dense (9, TB) tiles.)
    x_t = jnp.pad(x.astype(jnp.float32), ((0, Bp - B), (0, 0))).T

    out_t = pl.pallas_call(
        mlp_kernel,
        out_shape=jax.ShapeDtypeStruct((F_OUT, Bp), jnp.float32),
        grid=(nb,),
        in_specs=[
            pl.BlockSpec((16, 16), lambda i: (0, 0)),      # params: VMEM-resident
            pl.BlockSpec((F_IN, TB), lambda i: (0, i)),    # batch tile (lane-dense)
        ],
        out_specs=pl.BlockSpec((F_OUT, TB), lambda i: (0, i)),
        compiler_params=pltpu.CompilerParams(
            dimension_semantics=("parallel",),             # megacore sharding on v7x
        ),
    )(packed, x_t)

    return out_t.T[:B]  # (B, 3)


def init_params(key):
    """PyTorch-style init: W (out, in), b (out,), U(-1/sqrt(fan_in), 1/sqrt(fan_in))."""
    ks = jax.random.split(key, 6)

    def lin(kw, kb, fan_out, fan_in):
        bound = 1.0 / (fan_in ** 0.5)
        w = jax.random.uniform(kw, (fan_out, fan_in), jnp.float32, -bound, bound)
        b = jax.random.uniform(kb, (fan_out,), jnp.float32, -bound, bound)
        return w, b

    w0, b0 = lin(ks[0], ks[1], H0, F_IN)
    w1, b1 = lin(ks[2], ks[3], H1, H0)
    w2, b2 = lin(ks[4], ks[5], F_OUT, H1)
    return {"w0": w0, "b0": b0, "w1": w1, "b1": b1, "w2": w2, "b2": b2}


def reference_forward(x, p):
    h = jax.nn.sigmoid(x @ p["w0"].T + p["b0"])
    h = jax.nn.sigmoid(h @ p["w1"].T + p["b1"])
    return h @ p["w2"].T + p["b2"]


if __name__ == "__main__":
    key = jax.random.PRNGKey(0)
    kx, kp = jax.random.split(key)

    B = 300  # deliberately not a multiple of the tile: exercises padding + multi-tile grid
    x = jax.random.normal(kx, (B, F_IN), dtype=jnp.float32)
    params = init_params(kp)

    # Small-tile path (3 batch tiles of 128) — exercises the grid + padding.
    out = classifier_forward(x, params, tb=128)
    out = jax.block_until_ready(out)

    # Default-tile path (single tile) — the production configuration.
    out_big = classifier_forward(x, params)
    out_big = jax.block_until_ready(out_big)

    ref = reference_forward(x, params)
    assert out.shape == (B, F_OUT)
    assert jnp.allclose(out, ref, atol=1e-4, rtol=1e-4), float(jnp.max(jnp.abs(out - ref)))
    assert jnp.allclose(out_big, ref, atol=1e-4, rtol=1e-4), float(jnp.max(jnp.abs(out_big - ref)))

    print("KERNEL_OK")
</pallas_src>

<mosaic_0001>
module attributes {stable_mosaic.version = 11 : i64} {
  func.func @mlp_kernel(%arg0: i32, %arg1: memref<16x16xf32, #tpu.memory_space<vmem>>, %arg2: memref<9x128xf32, #tpu.memory_space<vmem>>, %arg3: memref<3x128xf32, #tpu.memory_space<vmem>>) attributes {dimension_semantics = [#tpu.dimension_semantics<parallel>], iteration_bounds = array<i64: 3>, scalar_prefetch = 0 : i64, scratch_operands = 0 : i64, tpu.core_type = #tpu.core_type<tc>, window_params = [{pipeline_mode = #tpu.pipeline_mode<synchronous>, transform_indices = @transform_0, window_bounds = array<i64: 16, 16>}, {transform_indices = @transform_1, window_bounds = array<i64: 9, 128>}, {transform_indices = @transform_2, window_bounds = array<i64: 3, 128>}]} {
    %c0 = arith.constant 0 : index
    %c0_0 = arith.constant 0 : index
    %0 = vector.load %arg2[%c0, %c0_0] : memref<9x128xf32, #tpu.memory_space<vmem>>, vector<9x128xf32>
    %c0_1 = arith.constant 0 : index
    %c0_2 = arith.constant 0 : index
    %1 = vector.load %arg1[%c0_1, %c0_2] : memref<16x16xf32, #tpu.memory_space<vmem>>, vector<4x9xf32>
    %c0_3 = arith.constant 0 : index
    %c9 = arith.constant 9 : index
    %2 = vector.load %arg1[%c0_3, %c9] : memref<16x16xf32, #tpu.memory_space<vmem>>, vector<4x1xf32>
    %c4 = arith.constant 4 : index
    %c0_4 = arith.constant 0 : index
    %3 = vector.load %arg1[%c4, %c0_4] : memref<16x16xf32, #tpu.memory_space<vmem>>, vector<4x4xf32>
    %c4_5 = arith.constant 4 : index
    %c4_6 = arith.constant 4 : index
    %4 = vector.load %arg1[%c4_5, %c4_6] : memref<16x16xf32, #tpu.memory_space<vmem>>, vector<4x1xf32>
    %c8 = arith.constant 8 : index
    %c0_7 = arith.constant 0 : index
    %5 = vector.load %arg1[%c8, %c0_7] : memref<16x16xf32, #tpu.memory_space<vmem>>, vector<3x4xf32>
    %c8_8 = arith.constant 8 : index
    %c4_9 = arith.constant 4 : index
    %6 = vector.load %arg1[%c8_8, %c4_9] : memref<16x16xf32, #tpu.memory_space<vmem>>, vector<3x1xf32>
    %cst = arith.constant dense<0.000000e+00> : vector<4x128xf32>
    %7 = tpu.matmul %1, %0, %cst {dimension_numbers = #tpu.dot_dimension_numbers<[1], [0], [0], [1], [0, 0, 1, 1], [], []>} : vector<4x9xf32>, vector<9x128xf32>, vector<4x128xf32> -> vector<4x128xf32>
    %8 = vector.broadcast %2 : vector<4x1xf32> to vector<4x128xf32>
    %9 = arith.addf %7, %8 : vector<4x128xf32>
    %cst_10 = arith.constant 5.000000e-01 : f32
    %10 = vector.broadcast %cst_10 : f32 to vector<4x128xf32>
    %11 = arith.mulf %10, %9 : vector<4x128xf32>
    %12 = math.tanh %11 : vector<4x128xf32>
    %cst_11 = arith.constant 1.000000e+00 : f32
    %13 = vector.broadcast %cst_11 : f32 to vector<4x128xf32>
    %14 = arith.addf %12, %13 : vector<4x128xf32>
    %cst_12 = arith.constant 5.000000e-01 : f32
    %15 = vector.broadcast %cst_12 : f32 to vector<4x128xf32>
    %16 = arith.mulf %15, %14 : vector<4x128xf32>
    %cst_13 = arith.constant dense<0.000000e+00> : vector<4x128xf32>
    %17 = tpu.matmul %3, %16, %cst_13 {dimension_numbers = #tpu.dot_dimension_numbers<[1], [0], [0], [1], [0, 0, 1, 1], [], []>} : vector<4x4xf32>, vector<4x128xf32>, vector<4x128xf32> -> vector<4x128xf32>
    %18 = vector.broadcast %4 : vector<4x1xf32> to vector<4x128xf32>
    %19 = arith.addf %17, %18 : vector<4x128xf32>
    %cst_14 = arith.constant 5.000000e-01 : f32
    %20 = vector.broadcast %cst_14 : f32 to vector<4x128xf32>
    %21 = arith.mulf %20, %19 : vector<4x128xf32>
    %22 = math.tanh %21 : vector<4x128xf32>
    %cst_15 = arith.constant 1.000000e+00 : f32
    %23 = vector.broadcast %cst_15 : f32 to vector<4x128xf32>
    %24 = arith.addf %22, %23 : vector<4x128xf32>
    %cst_16 = arith.constant 5.000000e-01 : f32
    %25 = vector.broadcast %cst_16 : f32 to vector<4x128xf32>
    %26 = arith.mulf %25, %24 : vector<4x128xf32>
    %cst_17 = arith.constant dense<0.000000e+00> : vector<3x128xf32>
    %27 = tpu.matmul %5, %26, %cst_17 {dimension_numbers = #tpu.dot_dimension_numbers<[1], [0], [0], [1], [0, 0, 1, 1], [], []>} : vector<3x4xf32>, vector<4x128xf32>, vector<3x128xf32> -> vector<3x128xf32>
    %28 = vector.broadcast %6 : vector<3x1xf32> to vector<3x128xf32>
    %29 = arith.addf %27, %28 : vector<3x128xf32>
    %c0_18 = arith.constant 0 : index
    %c0_19 = arith.constant 0 : index
    %30 = vector.load %arg3[%c0_18, %c0_19] : memref<3x128xf32, #tpu.memory_space<vmem>>, vector<3x128xf32>
    tpu.vector_store %arg3[%c0_18, %c0_19], %29 {strides = array<i32>} : memref<3x128xf32, #tpu.memory_space<vmem>>, vector<3x128xf32>,
    return
  }
  func.func @transform_0(%arg0: i32) -> (i32, i32) {
    %c0_i32 = arith.constant 0 : i32
    %c0_i32_0 = arith.constant 0 : i32
    %c0_i32_1 = arith.constant 0 : i32
    return %c0_i32, %c0_i32_0 : i32, i32
  }
  func.func @transform_1(%arg0: i32) -> (i32, i32) {
    %c0_i32 = arith.constant 0 : i32
    %c0_i32_0 = arith.constant 0 : i32
    return %c0_i32, %arg0 : i32, i32
  }
  func.func @transform_2(%arg0: i32) -> (i32, i32) {
    %c0_i32 = arith.constant 0 : i32
    %c0_i32_0 = arith.constant 0 : i32
    return %c0_i32, %arg0 : i32, i32
  }
}

</mosaic_0001>

<bundles_post_ra>
// kernel: classifier_forward.1
= control target key start
LH: loop header
LB: loop body
LE: loop exit
PB: predicated region body
PF: predicated region fallthrough
CT: control target
= control target key end

     0   :  { %7 = vsyncpa [#allocation4], 0  ;;  %s824_s0 = inlined_call_operand.vmem [shape: f32[16,16], index: 0, kind: input, shape index: {}]   ;;  %s825_s1 = inlined_call_operand.vmem [shape: f32[9,384], index: 1, kind: input, shape index: {}]   ;;  %s826_s2 = inlined_call_operand.hbm [shape: f32[3,384], index: 2, kind: output, shape index: {}]  }
   0x1   :  { %9 = vsyncpa [#allocation4 + $0x1], 0  ;;  %s701_s9 = smov 0   ;;  %s703_s10 = smov 0  }
   0x2   :  { %s705_s11 = smov 0   ;;  %s707_s12 = smov 0  }
   0x3 LB: > { %s516_s13 = sadd.s32 4294967295, %s677_s12   ;;  %s517_s14 = sadd.s32 4294967294, %s677_s12   ;;  %s677_s12 = sphi %s707_s12, %s832_s12   ;;  %s673_s11 = sphi %s705_s11, %s831_s11   ;;  %s669_s10 = sphi %s703_s10, %s830_s10   ;;  %s665_s9 = sphi %s701_s9, %s829_s9  }
   0x4   : > { %s724_s15 = sadd.s32 1, %s677_s12   ;;  %s43_s16 = sadd.s32 1, %s673_s11 }
   0x5   : > { %s40_s17 = ssub.s32 %s677_s12, %s724_s15  ;;  %p50_p0 = scmp.ne.s32.totalorder %s673_s11, %s669_s10 }
   0x6   : > { %p41_p1 = scmp.eq.s32.totalorder %s40_s17, 0  ;;  %p51_p2 = scmp.eq.s32.totalorder %s677_s12, 0 }
   0x7   : > { %p80_p3 = scmp.eq.s32.totalorder %s516_s13, 2  ;;  %p85_p4 = scmp.ne.s32.totalorder %s669_s10, %s665_s9 }
   0x8   : > { %s737_s18 = scalar_select %p41_p1, %s673_s11, %s43_s16  }
   0x9   : > { %p52_p5 = por %p51_p2, %p50_p0  ;;  %p739_p6 = por %p80_p3, %p50_p0 }
   0xa   : > { %p86_p7 = scmp.eq.s32.totalorder %s517_s14, 2  ;;  %p519_p9 = scmp.ge.s32.totalorder %s677_s12, 3 }
   0xc   : > { %p743_p8 = por %p86_p7, %p85_p4  ;;  %105 = sbr.rel (%p519_p9) target bundleno = 26 (0x1a), region = 20 }
  0x13   : > { %108 = sbr.rel (!%p52_p5) target bundleno = 26 (0x1a), region = 24  ;;  %s110_s21 = sand.u32 (%p52_p5), 1, %s673_s11  }
  0x14   : > { %s521_s22 = sshll.u32 (%p52_p5), %s677_s12, 3  ;;  %s520_s23 = sshll.u32 (%p52_p5), %s110_s21, 4 }
  0x15   : > { %s114_s26 = scalar_lea.vmem (%p52_p5), %s825_s1, %s521_s22  ;;  %s112_s27 = scalar_lea.vmem (%p52_p5), [#allocation2], %s520_s23 }
  0x16   : > { %v144_v0 = vld [vmem:[%s114_s26] sm:$0xff] (%p52_p5)  ;;  %v146_v1 = vld [vmem:[%s114_s26 + $0x18] sm:$0xff] (%p52_p5) }
  0x17   : > { %145 = vst [vmem:[%s112_s27] sm:$0xff] (%p52_p5), %v144_v0  ;;  %147 = vst [vmem:[%s112_s27 + $0x8] sm:$0xff] (%p52_p5), %v146_v1 }
  0x1a PF: > { %p522_p10 = scmp.ge.s32.totalorder %s677_s12, 1  ;;  %p152_p11 = scmp.lt.s32.totalorder %s677_s12, 4 }
  0x1c   : > { %p153_p12 = pnand %p522_p10, %p152_p11 }
  0x1d   : > { %s756_s28 = sand.u32 (!%p153_p12), 1, %s669_s10   ;;  %vm193_vm0 = vcmask (!%p153_p12), 1040384   ;;  %v679_v2 = vmov (!%p153_p12), 0.0|0.0   ;;  %vm680_vm1 = vmmov (!%p153_p12), 0   ;;  %v681_v3 = vmov (!%p153_p12), 0.0   ;;  %s532_s16 = sshll.u32 (!%p153_p12), %s516_s13, 6 }
  0x1e   : > { %156 = sbr.rel (%p153_p12) target bundleno = 730 (0x2da), region = 62  ;;  %559 = vmatprep.subr.bf16.mxu0 (!%p153_p12), %v679_v2  ;;  %s523_s29 = sshll.u32 (!%p153_p12), %s756_s28, 4  ;;  %546 = vmatprep.mubr.msk.f32.mxu0 (!%p153_p12), %vm680_vm1, %v681_v3  ;;  %v182_v4 = vld [vmem:[%s824_s0] sm:$0xf] (!%p153_p12)  ;;  %v682_v5 = vmov (!%p153_p12), 9   ;;  %vm683_vm2 = vmmov (!%p153_p12), 1  }
  0x1f   : > { %608 = vset.pattern.permute.xlu0 (!%p153_p12), %v682_v5  ;;  %s161_s4 = scalar_lea.vmem (!%p153_p12), [#allocation2], %s523_s29  ;;  %vm561_vm3 = vmpackc.low (!%p153_p12), %vm193_vm0, %vm683_vm2  ;;  %549 = vmatprep.subr.mxu1 (!%p153_p12), %v681_v3  ;;  %vm190_vm4 = vcmask (!%p153_p12), 72704   ;;  %v183_v9 = vld [vmem:[%s824_s0 + $0x4] sm:$0xf] (!%p153_p12)  ;;  %v684_v10 = vmov (!%p153_p12), 4   ;;  %vm279_vm5 = vcmask (!%p153_p12), 1043456   ;;  %s781_s24 = scalar_lea.hbm (!%p153_p12), %s826_s2, %s532_s16 }
  0x20   : > { %v180_v6 = vld [vmem:[%s161_s4] sm:$0xff] (!%p153_p12)  ;;  %v181_v7 = vld [vmem:[%s161_s4 + $0x8] sm:$0x1] (!%p153_p12)  ;;  %187 = vperm.xlu0 (!%p153_p12), %608, %v182_v4   ;;  %551 = vmatprep.mubr.msk.f32.mxu1 (!%p153_p12), %vm680_vm1, %v681_v3  ;;  %vm276_vm6 = vcmask (!%p153_p12), 31744   ;;  %s524_s14 = sshll.u32 (!%p153_p12), %s756_s28, 2  ;;  %s439_s25 = scalar_lea.sflag (!%p153_p12), [#allocation4], %s756_s28 }
  0x21   : > { %v560_v8 = vpack.c.bf16 (!%p153_p12), %v181_v7, %v180_v6  ;;  %610 = vset.pattern.permute.xlu1 (!%p153_p12), %v684_v10  ;;  %v184_v19 = vld [vmem:[%s824_s0 + $0x8] sm:$0x7] (!%p153_p12)  ;;  %s179_s17 = scalar_lea.vmem (!%p153_p12), [#allocation3], %s524_s14  ;;  %s685_s13 = smov (!%p153_p12), [#allocation3]  }
  0x22   : > { %359 = vperm.xlu1 (!%p153_p12), %610, %v184_v19   ;;  %s452_s21 = sshll.u32 (!%p153_p12), %s179_s17, 4  ;;  %s619_s27 = sshll.u32 (!%p153_p12), %s685_s13, 4  ;;  %s783_s21 = int_to_ptr.vmem [resolvable:$true] %s452_s21  ;;  %s620_s27 = int_to_ptr.vmem [resolvable:$false] %s619_s27 }
  0x23   : > { %562 = vmatpush3.bf16.msk.msra.mxu0 (!%p153_p12), %vm561_vm3, %v560_v8  ;;  %s615_s26 = scalar_lea.vmem (!%p153_p12), %s783_s21, 64  ;;  %s621_s29 = scalar_lea.vmem (!%p153_p12), %s620_s27, 128 }
  0x24   : > { %609 = vset.pattern.permute.xlu0 (!%p153_p12), %v684_v10  ;;  %p616_p13 = scmp.ne.s32.totalorder (!%p153_p12), %s783_s21, %s615_s26  ;;  %p622_p2 = scmp.lt.s32.totalorder (!%p153_p12), %s783_s21, %s620_s27 }
  0x25   : > { %273 = vperm.xlu0 %609, %v183_v9   ;;  %p623_p3 = scmp.lt.s32.totalorder %s621_s29, %s615_s26 }
  0x26   : > { %547 = vmatmul.mubr.msk.f32.vlgmr.msra.gmra.mrb[0].mxu0 %vm190_vm4, %v182_v4  ;;  %p617_p0 = pnand %p616_p13, %p739_p6 }
  0x27   : > { %p624_p4 = por %p623_p3, %p622_p2 }
  0x28   : > { %p618_p1 = pneg %p617_p0 }
  0x2a   : > { %p625_p5 = pnand %p624_p4, %p618_p1 }
  0x9f   : > { %v188_v11 = vpop.permute.xlu0 %187 }
  0xa1   : > { %v360_v28 = vpop.permute.xlu1 %359 }
  0xa4   : > { %v274_v20 = vpop.permute.xlu0 %273 }
  0xf9   : > { %v263_v12 = vpop.f32.mrb[0].mxu0 }
  0xfa   : > { %v264_v13 = vadd.f32 %v263_v12, %v188_v11  ;;  %v548_v14 = vpop.f32.mrb[1].mxu0 }
  0xfc   : > { %v267_v15 = vmul.f32 0.5, %v264_v13 }
  0xfe   : > { %611 = vtanh.f32 %v267_v15 }
 0x108   : > { %v612_v16 = vpop.eup %611 }
 0x109   : > { %v269_v17 = vadd.f32 1.0, %v612_v16 }
 0x10b   : > { %v270_v18 = vmul.f32 0.5, %v269_v17 }
 0x10d   : > { %550 = vmatpush3.msk.msra.mxu1 %vm279_vm5, %v270_v18 }
 0x10e   : > { %552 = vmatmul.mubr.msk.f32.vlgmr.msra.gmra.mrb[0].mxu1 %vm276_vm6, %v183_v9  ;;  %554 = vmatprep.subr.mxu1 %v681_v3 }
 0x10f   : > { %556 = vmatprep.mubr.msk.f32.mxu1 %vm680_vm1, %v681_v3 }
 0x1e1   : > { %v349_v21 = vpop.f32.mrb[0].mxu1 }
 0x1e2   : > { %v350_v22 = vadd.f32 %v349_v21, %v274_v20  ;;  %v553_v23 = vpop.f32.mrb[1].mxu1 }
 0x1e4   : > { %v353_v24 = vmul.f32 0.5, %v350_v22 }
 0x1e6   : > { %613 = vtanh.f32 %v353_v24 }
 0x1f0   : > { %v614_v25 = vpop.eup %613 }
 0x1f1   : > { %v355_v26 = vadd.f32 1.0, %v614_v25 }
 0x1f3   : > { %v356_v27 = vmul.f32 0.5, %v355_v26 }
 0x1f5   : > { %555 = vmatpush3.msk.msra.mxu1 %vm279_vm5, %v356_v27 }
 0x1f6   : > { %557 = vmatmul.mubr.msk.f32.vlgmr.msra.gmra.mrb[2].mxu1 %vm276_vm6, %v184_v19 }
 0x2c9   : > { %v433_v29 = vpop.f32.mrb[2].mxu1 }
 0x2ca   : > { %v434_v30 = vadd.f32 %v433_v29, %v360_v28  ;;  %v558_v31 = vpop.f32.mrb[3].mxu1 }
 0x2cc   : > { %437 = vst [vmem:[%s179_s17] sm:$0x7] %v434_v30 }
 0x2cd   : > { %628 = shalt.err (!%p625_p5)
}
 0x2ce   : > { %s629_s28 = scalar_lea.hbm %s781_s24, 64  ;;  %s633_s4 = scalar_lea.hbm %s826_s2, 192 }
 0x2cf   : > { %p630_p7 = scmp.ne.s32.totalorder %s781_s24, %s629_s28  ;;  %p634_p11 = scmp.lt.u32.totalorder %s781_s24, %s826_s2 }
 0x2d0   : > { %p635_p12 = scmp.lt.u32.totalorder %s633_s4, %s629_s28  ;;  %p637_p0 = scmp.lt.u32.totalorder %s629_s28, %s781_s24 }
 0x2d1   : > { %p631_p9 = pnand %p630_p7, %p739_p6 }
 0x2d2   : > { %p636_p13 = por %p635_p12, %p634_p11 }
 0x2d3   : > { %p632_p10 = pneg %p631_p9 }
 0x2d4   : > { %p638_p1 = por %p637_p0, %p636_p13 }
 0x2d6   : > { %p639_p2 = pnand %p638_p1, %p632_p10 }
 0x2d8   : > { %642 = shalt.err (!%p639_p2)
}
 0x2d9   : > { %563 = dma.vmem_to_hbm [thread:$0]  (%p739_p6), %s783_s21, 64, %s781_s24, %s439_s25  }
 0x2da PF: > { %p569_p3 = scmp.ge.s32.totalorder %s677_s12, 2  ;;  %s464_s7 = sand.u32 1, %s665_s9  }
 0x2db   : > { %s465_s8 = scalar_lea.sflag [#allocation4], %s464_s7 }
 0x2dc   : > { %p566_p4 = pnand %p569_p3, %p743_p8 }
 0x2de   : > { %660 = dma.done.wait (!%p566_p4), %s465_s8, 64  }
 0x2df   : > { %662 = vsyncadd (!%p566_p4), %s465_s8, 4294967232  ;;  %p12_p5 = scmp.ge.s32.totalorder %s724_s15, 5   ;;  %s829_s9 = smov %s669_s10 }
 0x2e0   : > { %s830_s10 = smov %s673_s11  ;;  %s831_s11 = smov %s737_s18 }
 0x2e1   : > { %s832_s12 = smov %s724_s15  ;;  %14 = sbr.rel (!%p12_p5) target bundleno = 3 (0x3), region = 106 }
 0x2e8   :  { %470 = vsyncpa [#allocation4], 1 }
 0x2e9   :  { %472 = vsyncpa [#allocation4 + $0x1], 1 }

</bundles_post_ra>
